<compile_context>
chip_gen: v5e
topology: v5e:2x2
jax: 0.10.0
libtpu: 0.0.40
codegen_flags: <defaults>
</compile_context>

<pallas_src>
import jax
import jax.numpy as jnp
from jax import lax
from jax.experimental import pallas as pl
from jax.experimental.pallas import tpu as pltpu

HIDDEN = 100        # PyTorch hidden width
HIDDEN_PAD = 128    # padded hidden width (lane-dense)
EPS = 1e-5


def _round_up(n, m):
    return ((n + m - 1) // m) * m


def _pad2(a, rows, cols):
    r, c = a.shape
    return jnp.pad(a, ((0, rows - r), (0, cols - c)))


# ---------------------------------------------------------------------------
# Fused Pallas kernel
# ---------------------------------------------------------------------------
def deeponet_kernel(x_ref, pts_ref, tms_ref, w1s_ref, wmid_ref, w4s_ref,
                    b123_ref, c4_ref, out_ref):
    """Fused branch1 / trunk / branch2 MLPs + triple-product contraction.

    w1s_ref : (3, d_in_pad, 128) bf16   first-layer weights   (net-major)
    wmid_ref: (6, 128, 128)     bf16    layers 2 & 3 weights  (net-major, layer-minor)
    w4s_ref : (3, 128, M)       bf16    last-layer weights
    b123_ref: (9, 128)          f32     layers 1..3 biases (BN folded)
    c4_ref  : (3, M)            f32     last-layer biases
    out_ref : (B, P*T)          f32     out[b, p*T+t] = sum_m b1[b,m]*tr[p,m]*b2[t,m]
    """
    b123 = b123_ref[...]          # (9, HIDDEN_PAD) f32 — tiny, load once
    c4 = c4_ref[...]              # (3, M) f32

    def mlp(h, net):
        # layer 1: Linear + folded-BN + ReLU (bf16 MXU inputs, f32 accum/elementwise)
        h = jnp.dot(h.astype(jnp.bfloat16), w1s_ref[net],
                    preferred_element_type=jnp.float32)
        h = jnp.maximum(h + b123[3 * net:3 * net + 1, :], 0.0)
        # layers 2 & 3
        for li in range(2):
            bidx = 3 * net + 1 + li
            h = jnp.dot(h.astype(jnp.bfloat16), wmid_ref[2 * net + li],
                        preferred_element_type=jnp.float32)
            h = jnp.maximum(h + b123[bidx:bidx + 1, :], 0.0)
        # layer 4: plain Linear
        h = jnp.dot(h.astype(jnp.bfloat16), w4s_ref[net],
                    preferred_element_type=jnp.float32)
        return h + c4[net:net + 1, :]

    b1 = mlp(x_ref[...], 0)       # (B, M)
    tr = mlp(pts_ref[...], 1)     # (P, M)
    b2 = mlp(tms_ref[...], 2)     # (T, M)

    P, M = tr.shape
    T = b2.shape[0]
    # outer[p*T+t, m] = tr[p,m] * b2[t,m]   (tile-aligned collapse: lanes = M unchanged)
    outer = (tr[:, None, :] * b2[None, :, :]).reshape(P * T, M)
    # out2d[b, q] = sum_m b1[b,m] * outer[q,m]   (A @ B^T, K = M = 32, f32)
    out_ref[...] = lax.dot_general(
        b1, outer,
        dimension_numbers=(((1,), (1,)), ((), ())),
        preferred_element_type=jnp.float32)


# ---------------------------------------------------------------------------
# One-time parameter preparation (pad + bf16 cast + pack) — NOT in the hot path
# ---------------------------------------------------------------------------
def prepare_params(p_branch1, p_trunk, p_branch2):
    nets = (p_branch1, p_trunk, p_branch2)        # net order used by the kernel
    M = p_branch1[-1][0].shape[1]
    d_in_pad = _round_up(max(net[0][0].shape[0] for net in nets), 8)

    w1s, wmid, w4s, b123, c4s = [], [], [], [], []
    for (w1, c1), (w2, c2), (w3, c3), (w4, c4) in nets:
        w1s.append(_pad2(w1, d_in_pad, HIDDEN_PAD))
        wmid.append(_pad2(w2, HIDDEN_PAD, HIDDEN_PAD))
        wmid.append(_pad2(w3, HIDDEN_PAD, HIDDEN_PAD))
        w4s.append(_pad2(w4, HIDDEN_PAD, M))
        b123.append(_pad2(c1, 1, HIDDEN_PAD))
        b123.append(_pad2(c2, 1, HIDDEN_PAD))
        b123.append(_pad2(c3, 1, HIDDEN_PAD))
        c4s.append(c4.reshape(1, M))

    return dict(
        w1s=jnp.stack(w1s).astype(jnp.bfloat16),     # (3, d_in_pad, 128)
        wmid=jnp.stack(wmid).astype(jnp.bfloat16),   # (6, 128, 128)
        w4s=jnp.stack(w4s).astype(jnp.bfloat16),     # (3, 128, M)
        b123=jnp.concatenate(b123, axis=0),          # (9, 128)  f32
        c4s=jnp.concatenate(c4s, axis=0),            # (3, M)    f32
    )


# ---------------------------------------------------------------------------
# Hot path: pad the three tiny inputs, one fused pallas_call
# ---------------------------------------------------------------------------
@jax.jit
def deeponet_forward(x, points, times, packed):
    B, P, T = x.shape[0], points.shape[0], times.shape[0]
    d_in_pad = packed["w1s"].shape[1]
    M = packed["w4s"].shape[-1]

    xp = _pad2(x, B, d_in_pad)
    ptsp = _pad2(points, P, d_in_pad)
    tmsp = _pad2(times, T, d_in_pad)

    # Advisory cost estimate for XLA scheduling.
    flops = 0
    dims = [d_in_pad, HIDDEN_PAD, HIDDEN_PAD, HIDDEN_PAD, M]
    for n in (B, P, T):
        flops += 2 * n * sum(dims[i] * dims[i + 1] for i in range(4))
    flops += P * T * M + 2 * B * P * T * M
    bytes_accessed = int(
        (xp.size + ptsp.size + tmsp.size) * 4
        + (packed["w1s"].size + packed["wmid"].size + packed["w4s"].size) * 2
        + (packed["b123"].size + packed["c4s"].size) * 4
        + B * P * T * 4)

    vmem = pl.BlockSpec(memory_space=pltpu.MemorySpace.VMEM)
    out2d = pl.pallas_call(
        deeponet_kernel,
        out_shape=jax.ShapeDtypeStruct((B, P * T), jnp.float32),
        in_specs=[vmem] * 8,
        out_specs=vmem,
        cost_estimate=pl.CostEstimate(
            flops=flops, transcendentals=0, bytes_accessed=bytes_accessed),
    )(xp, ptsp, tmsp, packed["w1s"], packed["wmid"], packed["w4s"],
      packed["b123"], packed["c4s"])

    return out2d.reshape(B, P, T)


# ---------------------------------------------------------------------------
# Deterministic parameter construction (eval-mode BN folded into Linear), f32
# ---------------------------------------------------------------------------
def make_mlp_params(key, d_in, d_out, hidden=HIDDEN):
    dims = [d_in, hidden, hidden, hidden, d_out]
    params = []
    for li in range(4):
        key, kw, kb, kg, kbe, krm, krv = jax.random.split(key, 7)
        W = 0.1 * jax.random.normal(kw, (dims[li], dims[li + 1]), jnp.float32)
        b = 0.1 * jax.random.normal(kb, (dims[li + 1],), jnp.float32)
        if li < 3:  # fold eval-mode BatchNorm1d into the Linear
            gamma = 1.0 + 0.1 * jax.random.normal(kg, (dims[li + 1],), jnp.float32)
            beta = 0.1 * jax.random.normal(kbe, (dims[li + 1],), jnp.float32)
            rmean = 0.1 * jax.random.normal(krm, (dims[li + 1],), jnp.float32)
            rvar = 0.5 + 0.5 * jnp.abs(jax.random.normal(krv, (dims[li + 1],), jnp.float32))
            scale = gamma / jnp.sqrt(rvar + EPS)
            W = W * scale[None, :]
            b = (b - rmean) * scale + beta
        params.append((W, b.reshape(1, -1)))
    return params


# ---------------------------------------------------------------------------
# Pure-JAX reference mirroring the kernel's mixed precision
# (bf16 weights/activations at the dots, f32 accumulation & elementwise)
# ---------------------------------------------------------------------------
def ref_mlp(x, params):
    h = x
    for i, (W, c) in enumerate(params):
        h = jnp.dot(h.astype(jnp.bfloat16), W.astype(jnp.bfloat16),
                    preferred_element_type=jnp.float32) + c
        if i < 3:
            h = jnp.maximum(h, 0.0)
    return h


def ref_forward(x, points, times, p1, pt, p2):
    b1 = ref_mlp(x, p1)
    tr = ref_mlp(points, pt)
    b2 = ref_mlp(times, p2)
    return jnp.einsum("bm,pm,tm->bpt", b1, tr, b2)


# ---------------------------------------------------------------------------
if __name__ == "__main__":
    B = 2                 # batch
    NUM_START_POINTS = 16
    MEDIUM = 32           # medium_size
    P = 16                # number of spatial points
    T = 8                 # number of time samples

    key = jax.random.PRNGKey(0)
    kx, kp, kt, k1, k2, k3 = jax.random.split(key, 6)

    x = jax.random.normal(kx, (B, NUM_START_POINTS), jnp.float32)
    points = jax.random.normal(kp, (P, 2), jnp.float32)
    times = jax.random.normal(kt, (T, 1), jnp.float32)

    p_branch1 = make_mlp_params(k1, NUM_START_POINTS, MEDIUM)
    p_branch2 = make_mlp_params(k2, 1, MEDIUM)
    p_trunk = make_mlp_params(k3, 2, MEDIUM)

    # One-time (hoisted) weight padding / packing / bf16 cast.
    packed = prepare_params(p_branch1, p_trunk, p_branch2)

    out = deeponet_forward(x, points, times, packed)
    out = jax.block_until_ready(out)

    ref = ref_forward(x, points, times, p_branch1, p_trunk, p_branch2)

    assert out.shape == (B, P, T), out.shape
    assert jnp.allclose(out, ref, atol=1e-2, rtol=1e-2), \
        float(jnp.max(jnp.abs(out - ref)))

    print("KERNEL_OK")
</pallas_src>

<mosaic_0001>
module attributes {stable_mosaic.version = 11 : i64} {
  func.func @deeponet_kernel(%arg0: memref<2x16xf32, #tpu.memory_space<vmem>>, %arg1: memref<16x16xf32, #tpu.memory_space<vmem>>, %arg2: memref<8x16xf32, #tpu.memory_space<vmem>>, %arg3: memref<3x16x128xbf16, #tpu.memory_space<vmem>>, %arg4: memref<6x128x128xbf16, #tpu.memory_space<vmem>>, %arg5: memref<3x128x32xbf16, #tpu.memory_space<vmem>>, %arg6: memref<9x128xf32, #tpu.memory_space<vmem>>, %arg7: memref<3x32xf32, #tpu.memory_space<vmem>>, %arg8: memref<2x128xf32, #tpu.memory_space<vmem>>) attributes {dimension_semantics = [], scalar_prefetch = 0 : i64, scratch_operands = 0 : i64, tpu.core_type = #tpu.core_type<tc>} {
    %c0 = arith.constant 0 : index
    %c0_0 = arith.constant 0 : index
    %0 = vector.load %arg6[%c0, %c0_0] : memref<9x128xf32, #tpu.memory_space<vmem>>, vector<9x128xf32>
    %c0_1 = arith.constant 0 : index
    %c0_2 = arith.constant 0 : index
    %1 = vector.load %arg7[%c0_1, %c0_2] : memref<3x32xf32, #tpu.memory_space<vmem>>, vector<3x32xf32>
    %c0_3 = arith.constant 0 : index
    %c0_4 = arith.constant 0 : index
    %2 = vector.load %arg0[%c0_3, %c0_4] : memref<2x16xf32, #tpu.memory_space<vmem>>, vector<2x16xf32>
    %3 = arith.truncf %2 : vector<2x16xf32> to vector<2x16xbf16>
    %c0_5 = arith.constant 0 : index
    %c0_6 = arith.constant 0 : index
    %c0_7 = arith.constant 0 : index
    %4 = vector.load %arg3[%c0_5, %c0_6, %c0_7] : memref<3x16x128xbf16, #tpu.memory_space<vmem>>, vector<1x16x128xbf16>
    %5 = vector.shape_cast %4 : vector<1x16x128xbf16> to vector<16x128xbf16>
    %cst = arith.constant dense<0.000000e+00> : vector<2x128xf32>
    %6 = tpu.matmul %3, %5, %cst {dimension_numbers = #tpu.dot_dimension_numbers<[1], [0], [0], [1], [0, 0, 1, 1], [], []>} : vector<2x16xbf16>, vector<16x128xbf16>, vector<2x128xf32> -> vector<2x128xf32>
    %7 = vector.extract_strided_slice %0 {offsets = [0, 0], sizes = [1, 128], strides = [1, 1]} : vector<9x128xf32> to vector<1x128xf32>
    %8 = vector.broadcast %7 : vector<1x128xf32> to vector<2x128xf32>
    %9 = arith.addf %6, %8 : vector<2x128xf32>
    %cst_8 = arith.constant 0.000000e+00 : f32
    %10 = vector.broadcast %cst_8 : f32 to vector<2x128xf32>
    %11 = arith.maximumf %9, %10 : vector<2x128xf32>
    %12 = arith.truncf %11 : vector<2x128xf32> to vector<2x128xbf16>
    %c0_9 = arith.constant 0 : index
    %c0_10 = arith.constant 0 : index
    %c0_11 = arith.constant 0 : index
    %13 = vector.load %arg4[%c0_9, %c0_10, %c0_11] : memref<6x128x128xbf16, #tpu.memory_space<vmem>>, vector<1x128x128xbf16>
    %14 = vector.shape_cast %13 : vector<1x128x128xbf16> to vector<128x128xbf16>
    %cst_12 = arith.constant dense<0.000000e+00> : vector<2x128xf32>
    %15 = tpu.matmul %12, %14, %cst_12 {dimension_numbers = #tpu.dot_dimension_numbers<[1], [0], [0], [1], [0, 0, 1, 1], [], []>} : vector<2x128xbf16>, vector<128x128xbf16>, vector<2x128xf32> -> vector<2x128xf32>
    %16 = vector.extract_strided_slice %0 {offsets = [1, 0], sizes = [1, 128], strides = [1, 1]} : vector<9x128xf32> to vector<1x128xf32>
    %17 = vector.broadcast %16 : vector<1x128xf32> to vector<2x128xf32>
    %18 = arith.addf %15, %17 : vector<2x128xf32>
    %cst_13 = arith.constant 0.000000e+00 : f32
    %19 = vector.broadcast %cst_13 : f32 to vector<2x128xf32>
    %20 = arith.maximumf %18, %19 : vector<2x128xf32>
    %21 = arith.truncf %20 : vector<2x128xf32> to vector<2x128xbf16>
    %c1 = arith.constant 1 : index
    %c0_14 = arith.constant 0 : index
    %c0_15 = arith.constant 0 : index
    %22 = vector.load %arg4[%c1, %c0_14, %c0_15] : memref<6x128x128xbf16, #tpu.memory_space<vmem>>, vector<1x128x128xbf16>
    %23 = vector.shape_cast %22 : vector<1x128x128xbf16> to vector<128x128xbf16>
    %cst_16 = arith.constant dense<0.000000e+00> : vector<2x128xf32>
    %24 = tpu.matmul %21, %23, %cst_16 {dimension_numbers = #tpu.dot_dimension_numbers<[1], [0], [0], [1], [0, 0, 1, 1], [], []>} : vector<2x128xbf16>, vector<128x128xbf16>, vector<2x128xf32> -> vector<2x128xf32>
    %25 = vector.extract_strided_slice %0 {offsets = [2, 0], sizes = [1, 128], strides = [1, 1]} : vector<9x128xf32> to vector<1x128xf32>
    %26 = vector.broadcast %25 : vector<1x128xf32> to vector<2x128xf32>
    %27 = arith.addf %24, %26 : vector<2x128xf32>
    %cst_17 = arith.constant 0.000000e+00 : f32
    %28 = vector.broadcast %cst_17 : f32 to vector<2x128xf32>
    %29 = arith.maximumf %27, %28 : vector<2x128xf32>
    %30 = arith.truncf %29 : vector<2x128xf32> to vector<2x128xbf16>
    %c0_18 = arith.constant 0 : index
    %c0_19 = arith.constant 0 : index
    %c0_20 = arith.constant 0 : index
    %31 = vector.load %arg5[%c0_18, %c0_19, %c0_20] : memref<3x128x32xbf16, #tpu.memory_space<vmem>>, vector<1x128x32xbf16>
    %32 = vector.shape_cast %31 : vector<1x128x32xbf16> to vector<128x32xbf16>
    %cst_21 = arith.constant dense<0.000000e+00> : vector<2x32xf32>
    %33 = tpu.matmul %30, %32, %cst_21 {dimension_numbers = #tpu.dot_dimension_numbers<[1], [0], [0], [1], [0, 0, 1, 1], [], []>} : vector<2x128xbf16>, vector<128x32xbf16>, vector<2x32xf32> -> vector<2x32xf32>
    %34 = vector.extract_strided_slice %1 {offsets = [0, 0], sizes = [1, 32], strides = [1, 1]} : vector<3x32xf32> to vector<1x32xf32>
    %35 = vector.broadcast %34 : vector<1x32xf32> to vector<2x32xf32>
    %36 = arith.addf %33, %35 : vector<2x32xf32>
    %c0_22 = arith.constant 0 : index
    %c0_23 = arith.constant 0 : index
    %37 = vector.load %arg1[%c0_22, %c0_23] : memref<16x16xf32, #tpu.memory_space<vmem>>, vector<16x16xf32>
    %38 = arith.truncf %37 : vector<16x16xf32> to vector<16x16xbf16>
    %c1_24 = arith.constant 1 : index
    %c0_25 = arith.constant 0 : index
    %c0_26 = arith.constant 0 : index
    %39 = vector.load %arg3[%c1_24, %c0_25, %c0_26] : memref<3x16x128xbf16, #tpu.memory_space<vmem>>, vector<1x16x128xbf16>
    %40 = vector.shape_cast %39 : vector<1x16x128xbf16> to vector<16x128xbf16>
    %cst_27 = arith.constant dense<0.000000e+00> : vector<16x128xf32>
    %41 = tpu.matmul %38, %40, %cst_27 {dimension_numbers = #tpu.dot_dimension_numbers<[1], [0], [0], [1], [0, 0, 1, 1], [], []>} : vector<16x16xbf16>, vector<16x128xbf16>, vector<16x128xf32> -> vector<16x128xf32>
    %42 = vector.extract_strided_slice %0 {offsets = [3, 0], sizes = [1, 128], strides = [1, 1]} : vector<9x128xf32> to vector<1x128xf32>
    %43 = vector.broadcast %42 : vector<1x128xf32> to vector<16x128xf32>
    %44 = arith.addf %41, %43 : vector<16x128xf32>
    %cst_28 = arith.constant 0.000000e+00 : f32
    %45 = vector.broadcast %cst_28 : f32 to vector<16x128xf32>
    %46 = arith.maximumf %44, %45 : vector<16x128xf32>
    %47 = arith.truncf %46 : vector<16x128xf32> to vector<16x128xbf16>
    %c2 = arith.constant 2 : index
    %c0_29 = arith.constant 0 : index
    %c0_30 = arith.constant 0 : index
    %48 = vector.load %arg4[%c2, %c0_29, %c0_30] : memref<6x128x128xbf16, #tpu.memory_space<vmem>>, vector<1x128x128xbf16>
    %49 = vector.shape_cast %48 : vector<1x128x128xbf16> to vector<128x128xbf16>
    %cst_31 = arith.constant dense<0.000000e+00> : vector<16x128xf32>
    %50 = tpu.matmul %47, %49, %cst_31 {dimension_numbers = #tpu.dot_dimension_numbers<[1], [0], [0], [1], [0, 0, 1, 1], [], []>} : vector<16x128xbf16>, vector<128x128xbf16>, vector<16x128xf32> -> vector<16x128xf32>
    %51 = vector.extract_strided_slice %0 {offsets = [4, 0], sizes = [1, 128], strides = [1, 1]} : vector<9x128xf32> to vector<1x128xf32>
    %52 = vector.broadcast %51 : vector<1x128xf32> to vector<16x128xf32>
    %53 = arith.addf %50, %52 : vector<16x128xf32>
    %cst_32 = arith.constant 0.000000e+00 : f32
    %54 = vector.broadcast %cst_32 : f32 to vector<16x128xf32>
    %55 = arith.maximumf %53, %54 : vector<16x128xf32>
    %56 = arith.truncf %55 : vector<16x128xf32> to vector<16x128xbf16>
    %c3 = arith.constant 3 : index
    %c0_33 = arith.constant 0 : index
    %c0_34 = arith.constant 0 : index
    %57 = vector.load %arg4[%c3, %c0_33, %c0_34] : memref<6x128x128xbf16, #tpu.memory_space<vmem>>, vector<1x128x128xbf16>
    %58 = vector.shape_cast %57 : vector<1x128x128xbf16> to vector<128x128xbf16>
    %cst_35 = arith.constant dense<0.000000e+00> : vector<16x128xf32>
    %59 = tpu.matmul %56, %58, %cst_35 {dimension_numbers = #tpu.dot_dimension_numbers<[1], [0], [0], [1], [0, 0, 1, 1], [], []>} : vector<16x128xbf16>, vector<128x128xbf16>, vector<16x128xf32> -> vector<16x128xf32>
    %60 = vector.extract_strided_slice %0 {offsets = [5, 0], sizes = [1, 128], strides = [1, 1]} : vector<9x128xf32> to vector<1x128xf32>
    %61 = vector.broadcast %60 : vector<1x128xf32> to vector<16x128xf32>
    %62 = arith.addf %59, %61 : vector<16x128xf32>
    %cst_36 = arith.constant 0.000000e+00 : f32
    %63 = vector.broadcast %cst_36 : f32 to vector<16x128xf32>
    %64 = arith.maximumf %62, %63 : vector<16x128xf32>
    %65 = arith.truncf %64 : vector<16x128xf32> to vector<16x128xbf16>
    %c1_37 = arith.constant 1 : index
    %c0_38 = arith.constant 0 : index
    %c0_39 = arith.constant 0 : index
    %66 = vector.load %arg5[%c1_37, %c0_38, %c0_39] : memref<3x128x32xbf16, #tpu.memory_space<vmem>>, vector<1x128x32xbf16>
    %67 = vector.shape_cast %66 : vector<1x128x32xbf16> to vector<128x32xbf16>
    %cst_40 = arith.constant dense<0.000000e+00> : vector<16x32xf32>
    %68 = tpu.matmul %65, %67, %cst_40 {dimension_numbers = #tpu.dot_dimension_numbers<[1], [0], [0], [1], [0, 0, 1, 1], [], []>} : vector<16x128xbf16>, vector<128x32xbf16>, vector<16x32xf32> -> vector<16x32xf32>
    %69 = vector.extract_strided_slice %1 {offsets = [1, 0], sizes = [1, 32], strides = [1, 1]} : vector<3x32xf32> to vector<1x32xf32>
    %70 = vector.broadcast %69 : vector<1x32xf32> to vector<16x32xf32>
    %71 = arith.addf %68, %70 : vector<16x32xf32>
    %c0_41 = arith.constant 0 : index
    %c0_42 = arith.constant 0 : index
    %72 = vector.load %arg2[%c0_41, %c0_42] : memref<8x16xf32, #tpu.memory_space<vmem>>, vector<8x16xf32>
    %73 = arith.truncf %72 : vector<8x16xf32> to vector<8x16xbf16>
    %c2_43 = arith.constant 2 : index
    %c0_44 = arith.constant 0 : index
    %c0_45 = arith.constant 0 : index
    %74 = vector.load %arg3[%c2_43, %c0_44, %c0_45] : memref<3x16x128xbf16, #tpu.memory_space<vmem>>, vector<1x16x128xbf16>
    %75 = vector.shape_cast %74 : vector<1x16x128xbf16> to vector<16x128xbf16>
    %cst_46 = arith.constant dense<0.000000e+00> : vector<8x128xf32>
    %76 = tpu.matmul %73, %75, %cst_46 {dimension_numbers = #tpu.dot_dimension_numbers<[1], [0], [0], [1], [0, 0, 1, 1], [], []>} : vector<8x16xbf16>, vector<16x128xbf16>, vector<8x128xf32> -> vector<8x128xf32>
    %77 = vector.extract_strided_slice %0 {offsets = [6, 0], sizes = [1, 128], strides = [1, 1]} : vector<9x128xf32> to vector<1x128xf32>
    %78 = vector.broadcast %77 : vector<1x128xf32> to vector<8x128xf32>
    %79 = arith.addf %76, %78 : vector<8x128xf32>
    %cst_47 = arith.constant 0.000000e+00 : f32
    %80 = vector.broadcast %cst_47 : f32 to vector<8x128xf32>
    %81 = arith.maximumf %79, %80 : vector<8x128xf32>
    %82 = arith.truncf %81 : vector<8x128xf32> to vector<8x128xbf16>
    %c4 = arith.constant 4 : index
    %c0_48 = arith.constant 0 : index
    %c0_49 = arith.constant 0 : index
    %83 = vector.load %arg4[%c4, %c0_48, %c0_49] : memref<6x128x128xbf16, #tpu.memory_space<vmem>>, vector<1x128x128xbf16>
    %84 = vector.shape_cast %83 : vector<1x128x128xbf16> to vector<128x128xbf16>
    %cst_50 = arith.constant dense<0.000000e+00> : vector<8x128xf32>
    %85 = tpu.matmul %82, %84, %cst_50 {dimension_numbers = #tpu.dot_dimension_numbers<[1], [0], [0], [1], [0, 0, 1, 1], [], []>} : vector<8x128xbf16>, vector<128x128xbf16>, vector<8x128xf32> -> vector<8x128xf32>
    %86 = vector.extract_strided_slice %0 {offsets = [7, 0], sizes = [1, 128], strides = [1, 1]} : vector<9x128xf32> to vector<1x128xf32>
    %87 = vector.broadcast %86 : vector<1x128xf32> to vector<8x128xf32>
    %88 = arith.addf %85, %87 : vector<8x128xf32>
    %cst_51 = arith.constant 0.000000e+00 : f32
    %89 = vector.broadcast %cst_51 : f32 to vector<8x128xf32>
    %90 = arith.maximumf %88, %89 : vector<8x128xf32>
    %91 = arith.truncf %90 : vector<8x128xf32> to vector<8x128xbf16>
    %c5 = arith.constant 5 : index
    %c0_52 = arith.constant 0 : index
    %c0_53 = arith.constant 0 : index
    %92 = vector.load %arg4[%c5, %c0_52, %c0_53] : memref<6x128x128xbf16, #tpu.memory_space<vmem>>, vector<1x128x128xbf16>
    %93 = vector.shape_cast %92 : vector<1x128x128xbf16> to vector<128x128xbf16>
    %cst_54 = arith.constant dense<0.000000e+00> : vector<8x128xf32>
    %94 = tpu.matmul %91, %93, %cst_54 {dimension_numbers = #tpu.dot_dimension_numbers<[1], [0], [0], [1], [0, 0, 1, 1], [], []>} : vector<8x128xbf16>, vector<128x128xbf16>, vector<8x128xf32> -> vector<8x128xf32>
    %95 = vector.extract_strided_slice %0 {offsets = [8, 0], sizes = [1, 128], strides = [1, 1]} : vector<9x128xf32> to vector<1x128xf32>
    %96 = vector.broadcast %95 : vector<1x128xf32> to vector<8x128xf32>
    %97 = arith.addf %94, %96 : vector<8x128xf32>
    %cst_55 = arith.constant 0.000000e+00 : f32
    %98 = vector.broadcast %cst_55 : f32 to vector<8x128xf32>
    %99 = arith.maximumf %97, %98 : vector<8x128xf32>
    %100 = arith.truncf %99 : vector<8x128xf32> to vector<8x128xbf16>
    %c2_56 = arith.constant 2 : index
    %c0_57 = arith.constant 0 : index
    %c0_58 = arith.constant 0 : index
    %101 = vector.load %arg5[%c2_56, %c0_57, %c0_58] : memref<3x128x32xbf16, #tpu.memory_space<vmem>>, vector<1x128x32xbf16>
    %102 = vector.shape_cast %101 : vector<1x128x32xbf16> to vector<128x32xbf16>
    %cst_59 = arith.constant dense<0.000000e+00> : vector<8x32xf32>
    %103 = tpu.matmul %100, %102, %cst_59 {dimension_numbers = #tpu.dot_dimension_numbers<[1], [0], [0], [1], [0, 0, 1, 1], [], []>} : vector<8x128xbf16>, vector<128x32xbf16>, vector<8x32xf32> -> vector<8x32xf32>
    %104 = vector.extract_strided_slice %1 {offsets = [2, 0], sizes = [1, 32], strides = [1, 1]} : vector<3x32xf32> to vector<1x32xf32>
    %105 = vector.broadcast %104 : vector<1x32xf32> to vector<8x32xf32>
    %106 = arith.addf %103, %105 : vector<8x32xf32>
    %107 = vector.shape_cast %71 : vector<16x32xf32> to vector<16x1x32xf32>
    %108 = vector.shape_cast %106 : vector<8x32xf32> to vector<1x8x32xf32>
    %109 = vector.broadcast %107 : vector<16x1x32xf32> to vector<16x8x32xf32>
    %110 = vector.broadcast %108 : vector<1x8x32xf32> to vector<16x8x32xf32>
    %111 = arith.mulf %109, %110 : vector<16x8x32xf32>
    %112 = vector.shape_cast %111 : vector<16x8x32xf32> to vector<128x32xf32>
    %cst_60 = arith.constant dense<0.000000e+00> : vector<2x128xf32>
    %113 = tpu.matmul %36, %112, %cst_60 {dimension_numbers = #tpu.dot_dimension_numbers<[1], [1], [0], [0], [0, 0, 1, 0], [], []>} : vector<2x32xf32>, vector<128x32xf32>, vector<2x128xf32> -> vector<2x128xf32>
    %c0_61 = arith.constant 0 : index
    %c0_62 = arith.constant 0 : index
    %114 = vector.load %arg8[%c0_61, %c0_62] : memref<2x128xf32, #tpu.memory_space<vmem>>, vector<2x128xf32>
    tpu.vector_store %arg8[%c0_61, %c0_62], %113 {strides = array<i32>} : memref<2x128xf32, #tpu.memory_space<vmem>>, vector<2x128xf32>,
    return
  }
}

</mosaic_0001>

<bundles_post_ra>
// kernel: deeponet_forward.1
= control target key start
LH: loop header
LB: loop body
LE: loop exit
PB: predicated region body
PF: predicated region fallthrough
CT: control target
= control target key end

     0   :  { %13 = vsyncpa [#allocation3], 0  ;;  %s1471_s30 = smov [#allocation2]   ;;  %s1472_s10 = smov 64   ;;  %s1683_s0 = inlined_call_operand.vmem [shape: f32[2,16], index: 0, kind: input, shape index: {}]   ;;  %s1684_s1 = inlined_call_operand.vmem [shape: f32[16,16], index: 1, kind: input, shape index: {}]   ;;  %s1685_s2 = inlined_call_operand.vmem [shape: f32[8,16], index: 2, kind: input, shape index: {}]   ;;  %s1686_s3 = inlined_call_operand.vmem [shape: bf16[3,16,128], index: 3, kind: input, shape index: {}]   ;;  %s1687_s4 = inlined_call_operand.hbm [shape: bf16[6,128,128], index: 4, kind: input, shape index: {}]   ;;  %s1688_s5 = inlined_call_operand.vmem [shape: bf16[3,128,32], index: 5, kind: input, shape index: {}]   ;;  %s1689_s6 = inlined_call_operand.vmem [shape: f32[9,128], index: 6, kind: input, shape index: {}]   ;;  %s1690_s7 = inlined_call_operand.vmem [shape: f32[3,32], index: 7, kind: input, shape index: {}]   ;;  %s1691_s8 = inlined_call_operand.vmem [shape: f32[2,128], index: 8, kind: output, shape index: {}]  }
   0x1   :  { %s26_s29 = sshll.u32 %s1687_s4, 4  ;;  %s28_s9 = sshll.u32 %s1471_s30, 4  ;;  %s27_s29 = int_to_ptr.hbm [resolvable:$true] %s26_s29  ;;  %s29_s9 = int_to_ptr.vmem [resolvable:$true] %s28_s9 }
   0x2   :  { %s1473_s11 = smov 4  }
   0x3   :  { %34 = dma.hbm_to_vmem [thread:$0]  %s27_s29, 6144, %s29_s9, [#allocation3], %s1472_s10, %s1472_s10, %s1473_s11  }
   0x4   :  { %1469 = dma.done.wait [#allocation3], 6144  }
   0x5   :  { %1470 = vsyncadd [#allocation3], 4294961152  ;;  %v1366_v0 = vld [vmem:[%s1686_s3] sm:$0xff]  ;;  %v1391_v2 = vld [vmem:[%s1686_s3 + $0x8] sm:$0xff]  ;;  %vm60_vm0 = vcmask 130048   ;;  %vm932_vm1 = vcmask 261120  }
   0x6   :  { %v49_v1 = vld [vmem:[%s1683_s0] sm:$0x3]  ;;  %v319_v5 = vld [vmem:[%s1684_s1 + $0x8] sm:$0xff]  ;;  %v1374_v6 = vld [vmem:[#allocation2 + $0x38] sm:$0xff]  ;;  %71 = vmatpush.bf16.msra.mxu2 %v1366_v0  ;;  %341 = vmatpush.bf16.msra.mxu0 %v1391_v2 }
   0x7   :  { %v50_v3 = vpack.c.bf16 %v49_v1, %v49_v1  ;;  %v318_v4 = vld [vmem:[%s1684_s1] sm:$0xff]  ;;  %144 = vmatpush.bf16.msra.mxu1 %v1374_v6  ;;  %v1373_v8 = vld [vmem:[#allocation2 + $0x30] sm:$0xff]  ;;  %v1372_v9 = vld [vmem:[#allocation2 + $0x28] sm:$0xff] }
   0x8   :  { %v320_v7 = vpack.c.bf16 %v319_v5, %v318_v4  ;;  %v1371_v10 = vld [vmem:[#allocation2 + $0x20] sm:$0xff]  ;;  %v1370_v11 = vld [vmem:[#allocation2 + $0x18] sm:$0xff]  ;;  %v1369_v12 = vld [vmem:[#allocation2 + $0x10] sm:$0xff] }
   0x9   :  { %1014 = vmatmul.msk.bf16.vlgmr.msra.gmra.mxu2 %vm60_vm0, %v50_v3  ;;  %v1368_v13 = vld [vmem:[#allocation2 + $0x8] sm:$0xff]  ;;  %v1367_v14 = vld [vmem:[#allocation2] sm:$0xff]  ;;  %v1399_v15 = vld [vmem:[#allocation2 + $0xb8] sm:$0xff] }
   0xa   :  { %1117 = vmatmul.msk.bf16.vlgmr.msra.gmra.mxu0 %vm60_vm0, %v320_v7  ;;  %v1398_v16 = vld [vmem:[#allocation2 + $0xb0] sm:$0xff]  ;;  %v1382_v17 = vld [vmem:[#allocation2 + $0x78] sm:$0xff]  ;;  %v1397_v19 = vld [vmem:[#allocation2 + $0xa8] sm:$0xff] }
   0xb   :  { %145 = vmatpush.bf16.msra.mxu1 %v1373_v8  ;;  %417 = vmatpush.bf16.msrb.mxu0 %v1399_v15  ;;  %v1381_v18 = vld [vmem:[#allocation2 + $0x70] sm:$0xff]  ;;  %v1380_v20 = vld [vmem:[#allocation2 + $0x68] sm:$0xff]  ;;  %v1396_v21 = vld [vmem:[#allocation2 + $0xa0] sm:$0xff] }
   0xc   :  { %225 = vmatpush.bf16.msra.mxu3 %v1382_v17  ;;  %v1379_v22 = vld [vmem:[#allocation2 + $0x60] sm:$0xff]  ;;  %v1395_v23 = vld [vmem:[#allocation2 + $0x98] sm:$0xff]  ;;  %v1394_v27 = vld [vmem:[#allocation2 + $0x90] sm:$0xff] }
   0xd   :  { %v1378_v24 = vld [vmem:[#allocation2 + $0x58] sm:$0xff]  ;;  %v1542_v25 = vld [vmem:[%s1689_s6] sm:$0xff]  ;;  %v1377_v29 = vld [vmem:[#allocation2 + $0x50] sm:$0xff] }
   0xe   :  { %v324_v28 = vperm.slane %v1542_v25, 3  ;;  %v53_v30 = vperm.slane %v1542_v25, 0  ;;  %v1393_v31 = vld [vmem:[#allocation2 + $0x88] sm:$0xff]  ;;  %v1392_v36 = vld [vmem:[#allocation2 + $0x80] sm:$0xff]  ;;  %v1416_v46 = vld [vmem:[%s1686_s3 + $0x10] sm:$0xff]  ;;  %v95_v61 = vperm.slane %v1542_v25, 1 }
   0xf   :  { %146 = vmatpush.bf16.msra.mxu1 %v1372_v9  ;;  %418 = vmatpush.bf16.msrb.mxu0 %v1398_v16  ;;  %v1376_v44 = vld [vmem:[#allocation2 + $0x48] sm:$0xff]  ;;  %v1375_v45 = vld [vmem:[#allocation2 + $0x40] sm:$0xff]  ;;  %v1407_v48 = vld [vmem:[#allocation2 + $0xf8] sm:$0xff]  ;;  %v368_v5 = vperm.slane %v1542_v25, 4 }
  0x10   :  { %226 = vmatpush.bf16.msra.mxu3 %v1381_v18  ;;  %v597_v47 = vld [vmem:[%s1685_s2] sm:$0xff]  ;;  %v1390_v50 = vld [vmem:[%s1688_s5 + $0x38] sm:$0xff]  ;;  %v1406_v51 = vld [vmem:[#allocation2 + $0xf0] sm:$0xff] }
  0x11   :  { %v598_v49 = vpack.c.bf16 %v597_v47, %v597_v47  ;;  %v1389_v52 = vld [vmem:[%s1688_s5 + $0x30] sm:$0xff]  ;;  %v1405_v53 = vld [vmem:[#allocation2 + $0xe8] sm:$0xff]  ;;  %v1404_v55 = vld [vmem:[#allocation2 + $0xe0] sm:$0xff] }
  0x12   :  { %v1388_v54 = vld [vmem:[%s1688_s5 + $0x28] sm:$0xff]  ;;  %v1387_v56 = vld [vmem:[%s1688_s5 + $0x20] sm:$0xff]  ;;  %v1403_v57 = vld [vmem:[#allocation2 + $0xd8] sm:$0xff] }
  0x13   :  { %147 = vmatpush.bf16.msra.mxu1 %v1371_v10  ;;  %419 = vmatpush.bf16.msrb.mxu0 %v1397_v19  ;;  %v1386_v58 = vld [vmem:[%s1688_s5 + $0x18] sm:$0xff]  ;;  %v1402_v59 = vld [vmem:[#allocation2 + $0xd0] sm:$0xff]  ;;  %v1401_v62 = vld [vmem:[#allocation2 + $0xc8] sm:$0xff] }
  0x14   :  { %227 = vmatpush.bf16.msra.mxu3 %v1380_v20  ;;  %v1385_v60 = vld [vmem:[%s1688_s5 + $0x10] sm:$0xff]  ;;  %v1384_v63 = vld [vmem:[%s1688_s5 + $0x8] sm:$0xff]  ;;  %v1400_v3 = vld [vmem:[#allocation2 + $0xc0] sm:$0xff] }
  0x15   :  { %v1383_v6 = vld [vmem:[%s1688_s5] sm:$0xff]  ;;  %v1424_v8 = vld [vmem:[#allocation2 + $0x138] sm:$0xff]  ;;  %v1422_v17 = vld [vmem:[#allocation2 + $0x128] sm:$0xff] }
  0x16   :  { %v1421_v18 = vld [vmem:[#allocation2 + $0x120] sm:$0xff]  ;;  %v1420_v19 = vld [vmem:[#allocation2 + $0x118] sm:$0xff]  ;;  %v1409_v47 = vld [vmem:[%s1688_s5 + $0x48] sm:$0xff] }
  0x17   :  { %148 = vmatpush.bf16.msra.mxu1 %v1370_v11  ;;  %420 = vmatpush.bf16.msrb.mxu0 %v1396_v21  ;;  %v1423_v11 = vld [vmem:[#allocation2 + $0x130] sm:$0xff] }
  0x18   :  { %228 = vmatpush.bf16.msra.mxu3 %v1379_v22  ;;  %v1419_v21 = vld [vmem:[#allocation2 + $0x110] sm:$0xff]  ;;  %v1418_v22 = vld [vmem:[#allocation2 + $0x108] sm:$0xff] }
  0x1b   :  { %149 = vmatpush.bf16.msra.mxu1 %v1369_v12  ;;  %421 = vmatpush.bf16.msrb.mxu0 %v1395_v23 }
  0x1c   :  { %229 = vmatpush.bf16.msra.mxu3 %v1378_v24  ;;  %v1417_v24 = vld [vmem:[#allocation2 + $0x100] sm:$0xff] }
  0x1f   :  { %150 = vmatpush.bf16.msra.mxu1 %v1368_v13  ;;  %422 = vmatpush.bf16.msrb.mxu0 %v1394_v27  ;;  %v1414_v27 = vld [vmem:[%s1688_s5 + $0x70] sm:$0xff] }
  0x20   :  { %230 = vmatpush.bf16.msra.mxu3 %v1377_v29  ;;  %v1431_v29 = vld [vmem:[#allocation2 + $0x170] sm:$0xff] }
  0x23   :  { %151 = vmatpush.bf16.msra.mxu1 %v1367_v14  ;;  %423 = vmatpush.bf16.msrb.mxu0 %v1393_v31  ;;  %v1413_v31 = vld [vmem:[%s1688_s5 + $0x68] sm:$0xff] }
  0x24   :  { %231 = vmatpush.bf16.msra.mxu3 %v1376_v44 }
  0x27   :  { %424 = vmatpush.bf16.msrb.mxu0 %v1392_v36  ;;  %500 = vmatpush.bf16.msrb.mxu1 %v1407_v48 }
  0x28   :  { %232 = vmatpush.bf16.msra.mxu3 %v1375_v45 }
  0x2b   :  { %619 = vmatpush.bf16.msra.mxu0 %v1416_v46  ;;  %501 = vmatpush.bf16.msrb.mxu1 %v1406_v51  ;;  %v1408_v51 = vld [vmem:[%s1688_s5 + $0x40] sm:$0xff] }
  0x2c   :  { %305 = vmatpush.bf16.msrb.mxu3 %v1390_v50 }
  0x2f   :  { %502 = vmatpush.bf16.msrb.mxu1 %v1405_v53 }
  0x30   :  { %306 = vmatpush.bf16.msrb.mxu3 %v1389_v52 }
  0x33   :  { %503 = vmatpush.bf16.msrb.mxu1 %v1404_v55  ;;  %v1429_v55 = vld [vmem:[#allocation2 + $0x160] sm:$0xff] }
  0x34   :  { %307 = vmatpush.bf16.msrb.mxu3 %v1388_v54  ;;  %v1430_v54 = vld [vmem:[#allocation2 + $0x168] sm:$0xff] }
  0x37   :  { %504 = vmatpush.bf16.msrb.mxu1 %v1403_v57  ;;  %v1427_v57 = vld [vmem:[#allocation2 + $0x150] sm:$0xff] }
  0x38   :  { %308 = vmatpush.bf16.msrb.mxu3 %v1387_v56  ;;  %v1428_v56 = vld [vmem:[#allocation2 + $0x158] sm:$0xff] }
  0x3b   :  { %505 = vmatpush.bf16.msrb.mxu1 %v1402_v59  ;;  %v1425_v59 = vld [vmem:[#allocation2 + $0x140] sm:$0xff] }
  0x3c   :  { %309 = vmatpush.bf16.msrb.mxu3 %v1386_v58  ;;  %v1426_v58 = vld [vmem:[#allocation2 + $0x148] sm:$0xff] }
  0x3f   :  { %506 = vmatpush.bf16.msrb.mxu1 %v1401_v62 }
  0x40   :  { %310 = vmatpush.bf16.msrb.mxu3 %v1385_v60  ;;  %v1440_v60 = vld [vmem:[%s1688_s5 + $0xb8] sm:$0xff] }
  0x43   :  { %507 = vmatpush.bf16.msrb.mxu1 %v1400_v3  ;;  %v1435_v3 = vld [vmem:[%s1688_s5 + $0x90] sm:$0xff] }
  0x44   :  { %311 = vmatpush.bf16.msrb.mxu3 %v1384_v63  ;;  %v1438_v63 = vld [vmem:[%s1688_s5 + $0xa8] sm:$0xff] }
  0x48   :  { %312 = vmatpush.bf16.msrb.mxu3 %v1383_v6 }
  0x87   :  { %v343_v26 = vpop.f32.mrf.mxu0 }
  0x88   :  { %v344_v32 = vadd.f32 %v343_v26, %v324_v28  ;;  %v1415_v26 = vld [vmem:[%s1688_s5 + $0x78] sm:$0xff] }
  0x89   :  { %583 = vmatpush.bf16.msrb.mxu2 %v1415_v26 }
  0x8a   :  { %v348_v38 = vmax.f32 %v344_v32, 0.0 }
  0x8c   :  { %v73_v33 = vpop.f32.mrf.mxu2 }
  0x8d   :  { %v74_v34 = vadd.f32 %v73_v33, %v53_v30  ;;  %v176_v30 = vperm.slane %v1542_v25, 2  ;;  %584 = vmatpush.bf16.msrb.mxu2 %v1414_v27 }
  0x8f   :  { %v345_v35 = vpop.f32.mrf.mxu0  ;;  %v77_v37 = vmax.f32 %v74_v34, 0.0  ;;  %v1412_v34 = vld [vmem:[%s1688_s5 + $0x60] sm:$0xff] }
  0x90   :  { %v346_v39 = vadd.f32 %v345_v35, %v324_v28  ;;  %v1432_v28 = vld [vmem:[#allocation2 + $0x178] sm:$0xff] }
  0x91   :  { %v78_v40 = vpack.c.bf16 %v77_v37, %v77_v37  ;;  %585 = vmatpush.bf16.msrb.mxu2 %v1413_v31 }
  0x92   :  { %v349_v41 = vmax.f32 %v346_v39, 0.0  ;;  %v602_v39 = vperm.slane %v1542_v25, 6 }
  0x93   :  { %152 = vmatmul.bf16.vlgmr.msra.gmra.mxu1 %v78_v40 }
  0x94   :  { %v350_v42 = vpack.c.bf16 %v349_v41, %v348_v38  ;;  %v75_v43 = vpop.f32.mrf.mxu2  ;;  %v1411_v38 = vld [vmem:[%s1688_s5 + $0x58] sm:$0xff]  ;;  %v451_v41 = vperm.slane %v1542_v25, 5  ;;  %855 = vmatpush.bf16.msra.mxu1 %v1440_v60 }
  0x95   :  { %586 = vmatpush.bf16.msrb.mxu2 %v1412_v34 }
  0x96   :  { %425 = vmatmul.bf16.vlgmr.msrb.gmra.mxu0 %v350_v42  ;;  %v1410_v42 = vld [vmem:[%s1688_s5 + $0x50] sm:$0xff] }
  0x97   :  { %774 = vmatpush.bf16.msrb.mxu0 %v1432_v28 }
  0x99   :  { %587 = vmatpush.bf16.msrb.mxu2 %v1411_v38 }
  0x9b   :  { %775 = vmatpush.bf16.msrb.mxu0 %v1431_v29 }
  0x9d   :  { %588 = vmatpush.bf16.msrb.mxu2 %v1410_v42 }
  0x9f   :  { %776 = vmatpush.bf16.msrb.mxu0 %v1430_v54 }
  0xa1   :  { %589 = vmatpush.bf16.msrb.mxu2 %v1409_v47 }
  0xa3   :  { %777 = vmatpush.bf16.msrb.mxu0 %v1429_v55 }
  0xa5   :  { %590 = vmatpush.bf16.msrb.mxu2 %v1408_v51 }
  0xa6   :  { %1236 = vmatmul.msk.bf16.vlgmr.msra.gmra.mxu0 %vm60_vm0, %v598_v49 }
  0xa7   :  { %778 = vmatpush.bf16.msrb.mxu0 %v1428_v56 }
  0xab   :  { %779 = vmatpush.bf16.msrb.mxu0 %v1427_v57 }
  0xaf   :  { %780 = vmatpush.bf16.msrb.mxu0 %v1426_v58 }
  0xb3   :  { %781 = vmatpush.bf16.msrb.mxu0 %v1425_v59 }
 0x110   :  { %v153_v0 = vpop.f32.mrf.mxu1 }
 0x111   :  { %v154_v1 = vadd.f32 %v153_v0, %v95_v61  ;;  %v1439_v61 = vld [vmem:[%s1688_s5 + $0xb0] sm:$0xff]  ;;  %v1437_v0 = vld [vmem:[%s1688_s5 + $0xa0] sm:$0xff] }
 0x112   :  { %856 = vmatpush.bf16.msra.mxu1 %v1439_v61 }
 0x113   :  { %v426_v2 = vpop.f32.mrf.mxu0  ;;  %v157_v4 = vmax.f32 %v154_v1, 0.0 }
 0x114   :  { %v427_v9 = vadd.f32 %v426_v2, %v368_v5  ;;  %v1436_v2 = vld [vmem:[%s1688_s5 + $0x98] sm:$0xff] }
 0x115   :  { %v158_v7 = vpack.c.bf16 %v157_v4, %v157_v4  ;;  %v644_v4 = vperm.slane %v1542_v25, 7  ;;  %v1444_v25 = vld [vmem:[%s1689_s6 + $0x8] ss:$0 sm:$0xff] }
 0x116   :  { %v431_v13 = vmax.f32 %v427_v9, 0.0  ;;  %857 = vmatpush.bf16.msra.mxu1 %v1438_v63 }
 0x117   :  { %233 = vmatmul.bf16.vlgmr.msra.gmra.mxu3 %v158_v7 }
 0x118   :  { %v155_v10 = vpop.f32.mrf.mxu1  ;;  %693 = vmatpush.bf16.msra.mxu3 %v1424_v8 }
 0x119   :  { %v1434_v10 = vld [vmem:[%s1688_s5 + $0x88] sm:$0xff] }
 0x11a   :  { %858 = vmatpush.bf16.msra.mxu1 %v1437_v0 }
 0x11b   :  { %v428_v12 = vpop.f32.mrf.mxu0 }
 0x11c   :  { %v429_v14 = vadd.f32 %v428_v12, %v368_v5  ;;  %694 = vmatpush.bf16.msra.mxu3 %v1423_v11  ;;  %v1433_v11 = vld [vmem:[%s1688_s5 + $0x80] sm:$0xff] }
 0x11e   :  { %v432_v15 = vmax.f32 %v429_v14, 0.0  ;;  %859 = vmatpush.bf16.msra.mxu1 %v1436_v2 }
 0x120   :  { %v433_v16 = vpack.c.bf16 %v432_v15, %v431_v13  ;;  %695 = vmatpush.bf16.msra.mxu3 %v1422_v17 }
 0x122   :  { %508 = vmatmul.bf16.vlgmr.msrb.gmra.mxu1 %v433_v16 }
 0x123   :  { %v621_v20 = vpop.f32.mrf.mxu0  ;;  %860 = vmatpush.bf16.msra.mxu1 %v1435_v3 }
 0x124   :  { %696 = vmatpush.bf16.msra.mxu3 %v1421_v18  ;;  %v622_v43 = vadd.f32 %v621_v20, %v602_v39  ;;  %v1639_v18 = vld [vmem:[%s1690_s7] sm:$0x7] }
 0x126   :  { %v625_v48 = vmax.f32 %v622_v43, 0.0 }
 0x127   :  { %861 = vmatpush.bf16.msra.mxu1 %v1434_v10  ;;  %v256_v10 = vperm.slane %v1639_v18, 0 }
 0x128   :  { %697 = vmatpush.bf16.msra.mxu3 %v1420_v19  ;;  %v626_v52 = vpack.c.bf16 %v625_v48, %v625_v48  ;;  %v534_v19 = vperm.slane %v1639_v18, 1 }
 0x12b   :  { %v623_v23 = vpop.f32.mrf.mxu0  ;;  %862 = vmatpush.bf16.msra.mxu1 %v1433_v11 }
 0x12c   :  { %698 = vmatpush.bf16.msra.mxu3 %v1419_v21 }
 0x130   :  { %699 = vmatpush.bf16.msra.mxu3 %v1418_v22  ;;  %v806_v22 = vperm.slane %v1639_v18, 2 }
 0x134   :  { %700 = vmatpush.bf16.msra.mxu3 %v1417_v24 }
 0x19a   :  { %v234_v32 = vpop.f32.mrf.mxu3 }
 0x19b   :  { %v235_v33 = vadd.f32 %v234_v32, %v176_v30 }
 0x19d   :  { %v238_v35 = vmax.f32 %v235_v33, 0.0 }
 0x19f   :  { %v509_v36 = vpop.f32.mrf.mxu1  ;;  %v239_v37 = vpack.c.bf16 %v238_v35, %v238_v35 }
 0x1a0   :  { %v510_v44 = vadd.f32 %v509_v36, %v451_v41 }
 0x1a1   :  { %313 = vmatmul.bf16.vlgmr.msrb.gmra.mxu3 %v239_v37 }
 0x1a2   :  { %v236_v40 = vpop.f32.mrf.mxu3  ;;  %v514_v49 = vmax.f32 %v510_v44, 0.0 }
 0x1a7   :  { %v511_v45 = vpop.f32.mrf.mxu1 }
 0x1a8   :  { %v512_v46 = vadd.f32 %v511_v45, %v451_v41 }
 0x1aa   :  { %v515_v50 = vmax.f32 %v512_v46, 0.0 }
 0x1ac   :  { %v516_v53 = vpack.c.bf16 %v515_v50, %v514_v49 }
 0x1ae   :  { %591 = vmatmul.bf16.vlgmr.msrb.gmra.mxu2 %v516_v53 }
 0x1b1   :  { %701 = vmatmul.bf16.vlgmr.msra.gmra.mxu3 %v626_v52 }
 0x224   :  { %v1612_v62 = vpop.f32.mrf.mxu3 }
 0x22c   :  { %v316_v1 = vpop.f32.mrf.mxu3 }
 0x231   :  { %v592_v17 = vpop.f32.mrf.mxu2 }
 0x232   :  { %v593_v46 = vadd.f32 %v592_v17, %v534_v19 }
 0x234   :  { %v702_v5 = vpop.f32.mrf.mxu3  ;;  %v876_v50 = vrot.slane %v593_v46, 7  ;;  %v875_v53 = vrot.slane %v593_v46, 6  ;;  %v874_v56 = vrot.slane %v593_v46, 5  ;;  %v873_v59 = vrot.slane %v593_v46, 4 }
 0x235   :  { %v703_v6 = vadd.f32 %v702_v5, %v644_v4  ;;  %v872_v63 = vrot.slane %v593_v46, 3  ;;  %v871_v2 = vrot.slane %v593_v46, 2  ;;  %v870_v5 = vrot.slane %v593_v46, 1 }
 0x236   :  { %v891_v52 = vperm.slane %v876_v50, 0  ;;  %v890_v55 = vperm.slane %v875_v53, 0  ;;  %v889_v58 = vperm.slane %v874_v56, 0  ;;  %v888_v61 = vperm.slane %v873_v59, 0 }
 0x237   :  { %v706_v7 = vmax.f32 %v703_v6, 0.0  ;;  %v887_v1 = vperm.slane %v872_v63, 0  ;;  %v886_v4 = vperm.slane %v871_v2, 0 }
 0x239   :  { %v707_v8 = vpack.c.bf16 %v706_v7, %v706_v7  ;;  %v594_v20 = vpop.f32.mrf.mxu2  ;;  %v885_v7 = vperm.slane %v870_v5, 0 }
 0x23a   :  { %v595_v21 = vadd.f32 %v594_v20, %v534_v19 }
 0x23b   :  { %782 = vmatmul.bf16.vlgmr.msrb.gmra.mxu0 %v707_v8 }
 0x23c   :  { %v704_v9 = vpop.f32.mrf.mxu3  ;;  %v883_v23 = vrot.slane %v595_v21, 7  ;;  %v882_v28 = vrot.slane %v595_v21, 6  ;;  %v881_v31 = vrot.slane %v595_v21, 5  ;;  %v880_v35 = vrot.slane %v595_v21, 4 }
 0x23d   :  { %v879_v38 = vrot.slane %v595_v21, 3  ;;  %v878_v41 = vrot.slane %v595_v21, 2  ;;  %v877_v44 = vrot.slane %v595_v21, 1  ;;  %v892_v49 = vperm.slane %v595_v21, 0 }
 0x23e   :  { %v899_v27 = vperm.slane %v883_v23, 0  ;;  %v898_v30 = vperm.slane %v882_v28, 0  ;;  %v897_v34 = vperm.slane %v881_v31, 0  ;;  %v896_v37 = vperm.slane %v880_v35, 0 }
 0x23f   :  { %v895_v40 = vperm.slane %v879_v38, 0  ;;  %v894_v43 = vperm.slane %v878_v41, 0  ;;  %v893_v47 = vperm.slane %v877_v44, 0  ;;  %v884_v9 = vperm.slane %v593_v46, 0 }
 0x2b8   :  { %v783_v12 = vpop.f32.mrf.mxu0 }
 0x2b9   :  { %v784_v13 = vadd.f32 %v1444_v25, %v783_v12  ;;  %v315_v25 = vadd.f32 %v1612_v62, %v256_v10 }
 0x2bb   :  { %v787_v14 = vmax.f32 %v784_v13, 0.0 }
 0x2bd   :  { %v788_v15 = vpack.c.bf16 %v787_v14, %v787_v14 }
 0x2bf   :  { %863 = vmatmul.bf16.vlgmr.msra.gmra.mxu1 %v788_v15 }
 0x2c0   :  { %v785_v16 = vpop.f32.mrf.mxu0 }
 0x33c   :  { %v864_v24 = vpop.f32.mrf.mxu1 }
 0x33d   :  { %v1643_v26 = vadd.f32 %v864_v24, %v806_v22 }
 0x33f   :  { %v931_v29 = vmul.f32 %v899_v27, %v1643_v26  ;;  %v930_v32 = vmul.f32 %v898_v30, %v1643_v26  ;;  %v929_v36 = vmul.f32 %v897_v34, %v1643_v26  ;;  %v928_v39 = vmul.f32 %v896_v37, %v1643_v26 }
 0x340   :  { %v927_v42 = vmul.f32 %v895_v40, %v1643_v26  ;;  %v926_v45 = vmul.f32 %v894_v43, %v1643_v26  ;;  %v925_v48 = vmul.f32 %v893_v47, %v1643_v26  ;;  %v924_v51 = vmul.f32 %v892_v49, %v1643_v26 }
 0x341   :  { %1349 = vmatpush.xpose.msk.msra.mxu2 %vm932_vm1, %v931_v29  ;;  %v923_v54 = vmul.f32 %v891_v52, %v1643_v26  ;;  %v922_v57 = vmul.f32 %v890_v55, %v1643_v26  ;;  %v921_v60 = vmul.f32 %v889_v58, %v1643_v26  ;;  %v920_v0 = vmul.f32 %v888_v61, %v1643_v26 }
 0x342   :  { %v919_v3 = vmul.f32 %v887_v1, %v1643_v26  ;;  %v918_v6 = vmul.f32 %v886_v4, %v1643_v26  ;;  %v917_v8 = vmul.f32 %v885_v7, %v1643_v26  ;;  %v916_v11 = vmul.f32 %v884_v9, %v1643_v26 }
 0x344   :  { %v866_v33 = vpop.f32.mrf.mxu1 }
 0x345   :  { %1350 = vmatpush.xpose.msk.msra.mxu2 %vm932_vm1, %v930_v32 }
 0x349   :  { %1351 = vmatpush.xpose.msk.msra.mxu2 %vm932_vm1, %v929_v36 }
 0x34d   :  { %1352 = vmatpush.xpose.msk.msra.mxu2 %vm932_vm1, %v928_v39 }
 0x351   :  { %1353 = vmatpush.xpose.msk.msra.mxu2 %vm932_vm1, %v927_v42 }
 0x355   :  { %1354 = vmatpush.xpose.msk.msra.mxu2 %vm932_vm1, %v926_v45 }
 0x359   :  { %1355 = vmatpush.xpose.msk.msra.mxu2 %vm932_vm1, %v925_v48 }
 0x35d   :  { %1356 = vmatpush.xpose.msk.msra.mxu2 %vm932_vm1, %v924_v51 }
 0x361   :  { %1357 = vmatpush.xpose.msk.msra.mxu2 %vm932_vm1, %v923_v54 }
 0x365   :  { %1358 = vmatpush.xpose.msk.msra.mxu2 %vm932_vm1, %v922_v57 }
 0x369   :  { %1359 = vmatpush.xpose.msk.msra.mxu2 %vm932_vm1, %v921_v60 }
 0x36d   :  { %1360 = vmatpush.xpose.msk.msra.mxu2 %vm932_vm1, %v920_v0 }
 0x371   :  { %1361 = vmatpush.xpose.msk.msra.mxu2 %vm932_vm1, %v919_v3 }
 0x375   :  { %1362 = vmatpush.xpose.msk.msra.mxu2 %vm932_vm1, %v918_v6 }
 0x379   :  { %1363 = vmatpush.xpose.msk.msra.mxu2 %vm932_vm1, %v917_v8 }
 0x37d   :  { %1364 = vmatpush.xpose.msk.msra.mxu2 %vm932_vm1, %v916_v11 }
 0x380   :  { %1365 = vmatmul.msk.f32.vlgmr.msra.gmra.mxu2 %vm932_vm1, %v315_v25 }
 0x403   :  { %v1001_v12 = vpop.f32.mrf.mxu2 }
 0x404   :  { %1004 = vst [vmem:[%s1691_s8] sm:$0x3] %v1001_v12 }
 0x405   :  { %1009 = vsyncpa [#allocation3], 1 }

</bundles_post_ra>
